<compile_context>
chip_gen: v7x
topology: tpu7x:2x2x1
jax: 0.10.0
libtpu: 0.0.40
codegen_flags: <defaults>
</compile_context>

<pallas_src>
import functools
import math

import jax
import jax.numpy as jnp
from jax.experimental import pallas as pl
from jax.experimental.pallas import tpu as pltpu

COMPUTE_DTYPE = jnp.bfloat16
# Above the 32 MiB scoped-VMEM default (v6e), below v7x's 64 MiB physical VMEM.
VMEM_LIMIT_BYTES = 48 * 1024 * 1024


def _cparams(dimension_semantics):
    return pltpu.CompilerParams(dimension_semantics=dimension_semantics,
                                vmem_limit_bytes=VMEM_LIMIT_BYTES)


def _pick_tile(dim, preferred, align):
    """Largest tile <= preferred that is a multiple of `align` and divides
    `dim`; falls back to the full dim (always a legal TPU block shape)."""
    if dim <= preferred:
        return dim
    t = (preferred // align) * align
    while t >= align:
        if dim % t == 0:
            return t
        t -= align
    return dim


def _gelu_tanh(y):
    # PyTorch / HF "gelu_pytorch_tanh", computed in f32 (v5e VPU has no bf16).
    c = math.sqrt(2.0 / math.pi)
    return 0.5 * y * (1.0 + jnp.tanh(c * (y + 0.044715 * y * y * y)))


# ----------------------------------------------------------------------------
# Pallas kernels
# ----------------------------------------------------------------------------

def _linear_kernel(x_ref, w_ref, b_ref, *rest, activation, has_residual):
    """o = act(x @ w + b) [+ residual], K-tiled with an f32 accumulator."""
    if has_residual:
        res_ref, o_ref, acc_ref = rest
    else:
        res_ref = None
        o_ref, acc_ref = rest

    @pl.when(pl.program_id(2) == 0)
    def _():
        acc_ref[...] = jnp.zeros_like(acc_ref)

    acc_ref[...] += jnp.dot(x_ref[...], w_ref[...],
                            preferred_element_type=jnp.float32)

    @pl.when(pl.program_id(2) == pl.num_programs(2) - 1)
    def _():
        y = acc_ref[...] + b_ref[...].astype(jnp.float32)
        if activation == "gelu_tanh":
            y = _gelu_tanh(y)
        if has_residual:
            y = y + res_ref[...].astype(jnp.float32)
        o_ref[...] = y.astype(o_ref.dtype)


def linear(x, w, b, residual=None, activation=None, tm=256, tn=512, tk=512):
    n, din = x.shape
    dout = w.shape[1]
    tm = _pick_tile(n, tm, 8)
    tn = _pick_tile(dout, tn, 128)
    tk = _pick_tile(din, tk, 128)
    grid = (n // tm, dout // tn, din // tk)

    in_specs = [
        pl.BlockSpec((tm, tk), lambda i, j, k: (i, k)),
        pl.BlockSpec((tk, tn), lambda i, j, k: (k, j)),
        pl.BlockSpec((1, tn), lambda i, j, k: (0, j)),
    ]
    operands = [x, w, b]
    has_residual = residual is not None
    if has_residual:
        in_specs.append(pl.BlockSpec((tm, tn), lambda i, j, k: (i, j)))
        operands.append(residual)

    return pl.pallas_call(
        functools.partial(_linear_kernel, activation=activation,
                          has_residual=has_residual),
        out_shape=jax.ShapeDtypeStruct((n, dout), x.dtype),
        grid=grid,
        in_specs=in_specs,
        out_specs=pl.BlockSpec((tm, tn), lambda i, j, k: (i, j)),
        scratch_shapes=[pltpu.VMEM((tm, tn), jnp.float32)],
        compiler_params=_cparams(("parallel", "parallel", "arbitrary")),
    )(*operands)


def _ln_linear_kernel(x_ref, g_ref, bt_ref, w_ref, b_ref, o_ref, *,
                      eps, activation):
    """o = act(LayerNorm(x) @ w + b). LN is computed in f32 in the matmul
    prologue; the full contraction dim is resident (<= ~1.2K for SigLIP)."""
    x = x_ref[...].astype(jnp.float32)
    mu = jnp.mean(x, axis=-1, keepdims=True)
    var = jnp.mean(jnp.square(x - mu), axis=-1, keepdims=True)
    xn = (x - mu) * jax.lax.rsqrt(var + eps)
    xn = xn * g_ref[...].astype(jnp.float32) + bt_ref[...].astype(jnp.float32)
    y = jnp.dot(xn.astype(w_ref.dtype), w_ref[...],
                preferred_element_type=jnp.float32)
    y = y + b_ref[...].astype(jnp.float32)
    if activation == "gelu_tanh":
        y = _gelu_tanh(y)
    o_ref[...] = y.astype(o_ref.dtype)


def ln_linear(x, gamma, beta, w, b, eps, activation=None, tm=256, tn=512):
    n, din = x.shape
    dout = w.shape[1]
    tm = _pick_tile(n, tm, 8)
    tn = _pick_tile(dout, tn, 128)
    grid = (n // tm, dout // tn)
    return pl.pallas_call(
        functools.partial(_ln_linear_kernel, eps=eps, activation=activation),
        out_shape=jax.ShapeDtypeStruct((n, dout), x.dtype),
        grid=grid,
        in_specs=[
            pl.BlockSpec((tm, din), lambda i, j: (i, 0)),
            pl.BlockSpec((1, din), lambda i, j: (0, 0)),
            pl.BlockSpec((1, din), lambda i, j: (0, 0)),
            pl.BlockSpec((din, tn), lambda i, j: (0, j)),
            pl.BlockSpec((1, tn), lambda i, j: (0, j)),
        ],
        out_specs=pl.BlockSpec((tm, tn), lambda i, j: (i, j)),
        compiler_params=_cparams(("parallel", "parallel")),
    )(x, gamma, beta, w, b)


def _patch_embed_kernel(x_ref, w_ref, b_ref, pos_ref, o_ref, *, rep):
    y = jnp.dot(x_ref[...], w_ref[...], preferred_element_type=jnp.float32)
    y = y + b_ref[...].astype(jnp.float32)
    pos = pos_ref[...].astype(jnp.float32)
    if rep > 1:
        pos = jnp.tile(pos, (rep, 1))
    o_ref[...] = (y + pos).astype(o_ref.dtype)


def patch_embed(patches, w, b, pos, seq_len, tn=512):
    """hidden = patches @ w + b + pos; the pos table is broadcast over batch
    inside the kernel instead of being tiled to batch size through HBM."""
    n, din = patches.shape
    dout = w.shape[1]
    batch = n // seq_len
    rep = max(1, min(batch, max(1, 256 // seq_len)))
    while batch % rep != 0:
        rep -= 1
    tm = rep * seq_len
    tn = _pick_tile(dout, tn, 128)
    grid = (n // tm, dout // tn)
    return pl.pallas_call(
        functools.partial(_patch_embed_kernel, rep=rep),
        out_shape=jax.ShapeDtypeStruct((n, dout), patches.dtype),
        grid=grid,
        in_specs=[
            pl.BlockSpec((tm, din), lambda i, j: (i, 0)),
            pl.BlockSpec((din, tn), lambda i, j: (0, j)),
            pl.BlockSpec((1, tn), lambda i, j: (0, j)),
            pl.BlockSpec((seq_len, tn), lambda i, j: (0, j)),
        ],
        out_specs=pl.BlockSpec((tm, tn), lambda i, j: (i, j)),
        compiler_params=_cparams(("parallel", "parallel")),
    )(patches, w, b, pos)


def _layernorm_kernel(x_ref, g_ref, b_ref, o_ref, *, eps):
    x = x_ref[...].astype(jnp.float32)
    mu = jnp.mean(x, axis=-1, keepdims=True)
    var = jnp.mean(jnp.square(x - mu), axis=-1, keepdims=True)
    y = (x - mu) * jax.lax.rsqrt(var + eps)
    y = y * g_ref[...].astype(jnp.float32) + b_ref[...].astype(jnp.float32)
    o_ref[...] = y.astype(o_ref.dtype)


def layernorm(x, gamma, beta, eps, tm=512):
    n, d = x.shape
    tm = _pick_tile(n, tm, 8)
    return pl.pallas_call(
        functools.partial(_layernorm_kernel, eps=eps),
        out_shape=jax.ShapeDtypeStruct((n, d), x.dtype),
        grid=(n // tm,),
        in_specs=[
            pl.BlockSpec((tm, d), lambda i: (i, 0)),
            pl.BlockSpec((1, d), lambda i: (0, 0)),
            pl.BlockSpec((1, d), lambda i: (0, 0)),
        ],
        out_specs=pl.BlockSpec((tm, d), lambda i: (i, 0)),
        compiler_params=_cparams(("parallel",)),
    )(x, gamma, beta)


def _flash_attn_kernel(q_ref, k_ref, v_ref, o_ref, m_sc, l_sc, acc_sc):
    """Online-softmax attention over kv tiles; q already carries 1/sqrt(Dh)."""
    kv = pl.program_id(2)

    @pl.when(kv == 0)
    def _():
        m_sc[...] = jnp.full_like(m_sc, -jnp.inf)
        l_sc[...] = jnp.zeros_like(l_sc)
        acc_sc[...] = jnp.zeros_like(acc_sc)

    s = jnp.einsum("bqd,bkd->bqk", q_ref[...], k_ref[...],
                   preferred_element_type=jnp.float32)
    m_new = jnp.maximum(m_sc[...], jnp.max(s, axis=-1, keepdims=True))
    alpha = jnp.exp(m_sc[...] - m_new)
    p = jnp.exp(s - m_new)
    l_sc[...] = alpha * l_sc[...] + jnp.sum(p, axis=-1, keepdims=True)
    acc_sc[...] = alpha * acc_sc[...] + jnp.einsum(
        "bqk,bkd->bqd", p.astype(v_ref.dtype), v_ref[...],
        preferred_element_type=jnp.float32)
    m_sc[...] = m_new

    @pl.when(kv == pl.num_programs(2) - 1)
    def _():
        o_ref[...] = (acc_sc[...] *
                      pl.reciprocal(l_sc[...], approx=True)).astype(o_ref.dtype)


def flash_attention(q, k, v, tq=256, tkv=512):
    """q, k, v: [B*H, S, Dh]. VMEM use is O(tile); the [S, S] score matrix is
    never materialized, so real SigLIP sizes (S=729) fit v7x's 64 MiB VMEM."""
    bh, s, dh = q.shape
    tq = _pick_tile(s, tq, 8)
    tkv = _pick_tile(s, tkv, 8)
    grid = (bh, s // tq, s // tkv)
    q_spec = pl.BlockSpec((1, tq, dh), lambda b, i, j: (b, i, 0))
    kv_spec = pl.BlockSpec((1, tkv, dh), lambda b, i, j: (b, j, 0))
    # TODO(synk): head_dim (< 128 lanes) is not padded to a lane-dense 128
    # multiple; doing so would remove masked partial stores on the output.
    return pl.pallas_call(
        _flash_attn_kernel,
        out_shape=jax.ShapeDtypeStruct(q.shape, q.dtype),
        grid=grid,
        in_specs=[q_spec, kv_spec, kv_spec],
        out_specs=pl.BlockSpec((1, tq, dh), lambda b, i, j: (b, i, 0)),
        scratch_shapes=[
            pltpu.VMEM((1, tq, 1), jnp.float32),
            pltpu.VMEM((1, tq, 1), jnp.float32),
            pltpu.VMEM((1, tq, dh), jnp.float32),
        ],
        compiler_params=_cparams(("parallel", "parallel", "arbitrary")),
    )(q, k, v)


# ----------------------------------------------------------------------------
# Parameter construction (deterministic, synthetic; bf16 MXU weights)
# ----------------------------------------------------------------------------

def make_params(key, cfg, compute_dtype=COMPUTE_DTYPE):
    d = cfg["hidden_size"]
    inter = cfg["intermediate_size"]
    c = cfg["num_channels"]
    p = cfg["patch_size"]
    nh = cfg["num_heads"]
    dh = d // nh
    num_patches = (cfg["image_size"] // p) ** 2
    patch_dim = c * p * p
    scale = dh ** -0.5  # folded into the Q projection below

    def normal(k, shape, std=0.02):
        return (std * jax.random.normal(k, shape)).astype(jnp.float32)

    keys = jax.random.split(key, 4 + cfg["num_layers"])
    params = {
        # Conv2d weight (d, c, p, p) flattened & transposed to (patch_dim, d)
        "patch_w": normal(keys[0], (patch_dim, d)).astype(compute_dtype),
        "patch_b": jnp.zeros((1, d), jnp.float32),
        "pos_emb": normal(keys[1], (num_patches, d)),
        "post_ln_g": jnp.ones((1, d), jnp.float32),
        "post_ln_b": jnp.zeros((1, d), jnp.float32),
        "layers": [],
    }
    for li in range(cfg["num_layers"]):
        lk = jax.random.split(keys[4 + li], 8)
        q_w = normal(lk[0], (d, d))
        k_w = normal(lk[1], (d, d))
        v_w = normal(lk[2], (d, d))
        q_b = jnp.zeros((d,), jnp.float32)
        k_b = jnp.zeros((d,), jnp.float32)
        v_b = jnp.zeros((d,), jnp.float32)
        layer = {
            "ln1_g": jnp.ones((1, d), jnp.float32),
            "ln1_b": jnp.zeros((1, d), jnp.float32),
            # fused QKV with 1/sqrt(head_dim) pre-folded into the Q slice
            "qkv_w": jnp.concatenate([q_w * scale, k_w, v_w],
                                     axis=1).astype(compute_dtype),
            "qkv_b": jnp.concatenate([q_b * scale, k_b, v_b]).reshape(1, 3 * d),
            "o_w": normal(lk[3], (d, d)).astype(compute_dtype),
            "o_b": jnp.zeros((1, d), jnp.float32),
            "ln2_g": jnp.ones((1, d), jnp.float32),
            "ln2_b": jnp.zeros((1, d), jnp.float32),
            "fc1_w": normal(lk[4], (d, inter)).astype(compute_dtype),
            "fc1_b": jnp.zeros((1, inter), jnp.float32),
            "fc2_w": normal(lk[5], (inter, d)).astype(compute_dtype),
            "fc2_b": jnp.zeros((1, d), jnp.float32),
        }
        params["layers"].append(layer)
    return params


# ----------------------------------------------------------------------------
# Forward pass (wrapper = glue; compute = Pallas kernels above)
# ----------------------------------------------------------------------------

def siglip_forward(pixel_values, params, cfg):
    """Returns (last_hidden_state, hidden_states_list), mirroring
    SiglipTransformer: embeddings -> N encoder layers -> post_layernorm."""
    b, c, h, w = pixel_values.shape
    p = cfg["patch_size"]
    d = cfg["hidden_size"]
    nh = cfg["num_heads"]
    dh = d // nh
    eps = cfg["layer_norm_eps"]
    n_h, n_w = h // p, w // p
    s = n_h * n_w

    # --- patch embedding: Conv2d(k=stride=p) == patch-extract + matmul ------
    patches = pixel_values.reshape(b, c, n_h, p, n_w, p)
    patches = patches.transpose(0, 2, 4, 1, 3, 5).reshape(b * s, c * p * p)
    patches = patches.astype(COMPUTE_DTYPE)

    hidden = patch_embed(patches, params["patch_w"], params["patch_b"],
                         params["pos_emb"], seq_len=s)
    hidden_states = [hidden.reshape(b, s, d)]

    # TODO(synk): head split/merge are still wrapper-level reshapes/transposes;
    # producing [B*H, S, Dh] directly from the QKV kernel's out_spec would
    # remove these extra HBM passes.
    def split_heads(qkv):
        t = qkv.reshape(b, s, 3, nh, dh).transpose(2, 0, 3, 1, 4)
        t = t.reshape(3, b * nh, s, dh)
        return t[0], t[1], t[2]

    def merge_heads(t):
        return t.reshape(b, nh, s, dh).transpose(0, 2, 1, 3).reshape(b * s, d)

    for layer in params["layers"]:
        # --- self-attention block (LN1 fused into the fused-QKV matmul) -----
        residual = hidden
        qkv = ln_linear(hidden, layer["ln1_g"], layer["ln1_b"],
                        layer["qkv_w"], layer["qkv_b"], eps=eps)
        q, k, v = split_heads(qkv)
        attn = flash_attention(q, k, v)
        hidden = linear(merge_heads(attn), layer["o_w"], layer["o_b"],
                        residual=residual)

        # --- MLP block (LN2 + gelu fused into fc1, residual fused into fc2) -
        residual = hidden
        x = ln_linear(hidden, layer["ln2_g"], layer["ln2_b"],
                      layer["fc1_w"], layer["fc1_b"], eps=eps,
                      activation="gelu_tanh")
        hidden = linear(x, layer["fc2_w"], layer["fc2_b"], residual=residual)

        hidden_states.append(hidden.reshape(b, s, d))

    last_hidden_state = layernorm(hidden, params["post_ln_g"],
                                  params["post_ln_b"], eps).reshape(b, s, d)
    # TODO(synk): SiglipConfig variants with a multihead-attention-pooling head
    # are not part of the given forward signature and are omitted.
    return last_hidden_state, hidden_states


# ----------------------------------------------------------------------------
# main
# ----------------------------------------------------------------------------

if __name__ == "__main__":
    cfg = dict(
        image_size=16,
        patch_size=8,
        num_channels=3,
        hidden_size=32,
        num_heads=4,
        intermediate_size=64,
        num_layers=2,
        layer_norm_eps=1e-6,
    )

    root = jax.random.PRNGKey(0)
    k_params, k_pix = jax.random.split(root)
    params = make_params(k_params, cfg)

    # NCHW input, matching the PyTorch module's pixel_values layout.
    pixel_values = jax.random.normal(
        k_pix, (2, cfg["num_channels"], cfg["image_size"], cfg["image_size"]),
        dtype=jnp.float32)

    last_hidden, hiddens = siglip_forward(pixel_values, params, cfg)
    last_hidden = jax.block_until_ready(last_hidden)
    for hst in hiddens:
        jax.block_until_ready(hst)

    assert last_hidden.shape == (2, (16 // 8) ** 2, cfg["hidden_size"])
    assert len(hiddens) == cfg["num_layers"] + 1
    assert bool(jnp.all(jnp.isfinite(last_hidden.astype(jnp.float32))))
    print("KERNEL_OK")
</pallas_src>

<mosaic_0001>
module attributes {stable_mosaic.version = 11 : i64} {
  func.func @_patch_embed_kernel(%arg0: i32, %arg1: i32, %arg2: memref<8x192xbf16, #tpu.memory_space<vmem>>, %arg3: memref<192x32xbf16, #tpu.memory_space<vmem>>, %arg4: memref<1x32xf32, #tpu.memory_space<vmem>>, %arg5: memref<4x32xf32, #tpu.memory_space<vmem>>, %arg6: memref<8x32xbf16, #tpu.memory_space<vmem>>) attributes {dimension_semantics = [#tpu.dimension_semantics<parallel>, #tpu.dimension_semantics<parallel>], iteration_bounds = array<i64: 1, 1>, scalar_prefetch = 0 : i64, scratch_operands = 0 : i64, tpu.core_type = #tpu.core_type<tc>, window_params = [{transform_indices = @transform_0, window_bounds = array<i64: 8, 192>}, {transform_indices = @transform_1, window_bounds = array<i64: 192, 32>}, {transform_indices = @transform_2, window_bounds = array<i64: 1, 32>}, {transform_indices = @transform_3, window_bounds = array<i64: 4, 32>}, {transform_indices = @transform_4, window_bounds = array<i64: 8, 32>}]} {
    %c0 = arith.constant 0 : index
    %c0_0 = arith.constant 0 : index
    %0 = vector.load %arg2[%c0, %c0_0] : memref<8x192xbf16, #tpu.memory_space<vmem>>, vector<8x192xbf16>
    %c0_1 = arith.constant 0 : index
    %c0_2 = arith.constant 0 : index
    %1 = vector.load %arg3[%c0_1, %c0_2] : memref<192x32xbf16, #tpu.memory_space<vmem>>, vector<192x32xbf16>
    %cst = arith.constant dense<0.000000e+00> : vector<8x32xf32>
    %2 = tpu.matmul %0, %1, %cst {dimension_numbers = #tpu.dot_dimension_numbers<[1], [0], [0], [1], [0, 0, 1, 1], [], []>} : vector<8x192xbf16>, vector<192x32xbf16>, vector<8x32xf32> -> vector<8x32xf32>
    %c0_3 = arith.constant 0 : index
    %c0_4 = arith.constant 0 : index
    %3 = vector.load %arg4[%c0_3, %c0_4] : memref<1x32xf32, #tpu.memory_space<vmem>>, vector<1x32xf32>
    %4 = vector.broadcast %3 : vector<1x32xf32> to vector<8x32xf32>
    %5 = arith.addf %2, %4 : vector<8x32xf32>
    %c0_5 = arith.constant 0 : index
    %c0_6 = arith.constant 0 : index
    %6 = vector.load %arg5[%c0_5, %c0_6] : memref<4x32xf32, #tpu.memory_space<vmem>>, vector<4x32xf32>
    %7 = tpu.concatenate %6, %6 in 0 : vector<4x32xf32>, vector<4x32xf32> -> vector<8x32xf32>
    %8 = arith.addf %5, %7 : vector<8x32xf32>
    %9 = arith.truncf %8 : vector<8x32xf32> to vector<8x32xbf16>
    %c0_7 = arith.constant 0 : index
    %c0_8 = arith.constant 0 : index
    %10 = vector.load %arg6[%c0_7, %c0_8] : memref<8x32xbf16, #tpu.memory_space<vmem>>, vector<8x32xbf16>
    tpu.vector_store %arg6[%c0_7, %c0_8], %9 {strides = array<i32>} : memref<8x32xbf16, #tpu.memory_space<vmem>>, vector<8x32xbf16>,
    return
  }
  func.func @transform_0(%arg0: i32, %arg1: i32) -> (i32, i32) {
    %c0_i32 = arith.constant 0 : i32
    %c0_i32_0 = arith.constant 0 : i32
    return %arg0, %c0_i32 : i32, i32
  }
  func.func @transform_1(%arg0: i32, %arg1: i32) -> (i32, i32) {
    %c0_i32 = arith.constant 0 : i32
    %c0_i32_0 = arith.constant 0 : i32
    return %c0_i32, %arg1 : i32, i32
  }
  func.func @transform_2(%arg0: i32, %arg1: i32) -> (i32, i32) {
    %c0_i32 = arith.constant 0 : i32
    %c0_i32_0 = arith.constant 0 : i32
    return %c0_i32, %arg1 : i32, i32
  }
  func.func @transform_3(%arg0: i32, %arg1: i32) -> (i32, i32) {
    %c0_i32 = arith.constant 0 : i32
    %c0_i32_0 = arith.constant 0 : i32
    return %c0_i32, %arg1 : i32, i32
  }
  func.func @transform_4(%arg0: i32, %arg1: i32) -> (i32, i32) {
    %c0_i32 = arith.constant 0 : i32
    return %arg0, %arg1 : i32, i32
  }
}

</mosaic_0001>

<bundles_post_ra>
// kernel: tpu_custom_call.1
= control target key start
LH: loop header
LB: loop body
LE: loop exit
PB: predicated region body
PF: predicated region fallthrough
CT: control target
= control target key end

     0   :  { %v253_v1 = vmov 0   ;;  %vm129_vm0 = vcmask 523264   ;;  %s337_s0 = inlined_call_operand.vmem [shape: bf16[8,192], index: 0, kind: input, shape index: {}]   ;;  %s338_s1 = inlined_call_operand.vmem [shape: bf16[192,32], index: 1, kind: input, shape index: {}]   ;;  %s339_s2 = inlined_call_operand.vmem [shape: f32[1,32], index: 2, kind: input, shape index: {}]   ;;  %s340_s3 = inlined_call_operand.vmem [shape: f32[4,32], index: 3, kind: input, shape index: {}]   ;;  %s341_s4 = inlined_call_operand.hbm [shape: bf16[8,32], index: 4, kind: output, shape index: {}]  }
   0x1   :  { %v215_v0 = vld [vmem:[%s338_s1] sm:$0xff]   ;;  %133 = vmatprep.subr.bf16.mxu0 %v253_v1  ;;  %v216_v2 = vld [vmem:[%s338_s1 + $0x8] sm:$0xff]   ;;  %v217_v3 = vld [vmem:[%s338_s1 + $0x10] sm:$0xff]  }
   0x2   :  { %134 = vmatpush1.bf16.msra.mxu0 %v215_v0  ;;  %v218_v4 = vld [vmem:[%s338_s1 + $0x18] sm:$0xff]   ;;  %v19_v5 = vld [vmem:[%s337_s0] sm:$0xff] }
   0x3   :  { %135 = vmatprep.subr.bf16.mxu0 %v253_v1 }
   0x6   :  { %136 = vmatpush1.bf16.msra.mxu0 %v216_v2 }
   0x7   :  { %137 = vmatprep.subr.bf16.mxu0 %v253_v1 }
   0xa   :  { %138 = vmatpush1.bf16.msra.mxu0 %v217_v3 }
   0xb   :  { %139 = vmatprep.subr.bf16.mxu0 %v253_v1 }
   0xc   :  { %9 = vsyncpa [#allocation3], 0  ;;  %v199_v6 = vcombine.high %v19_v5, %v19_v5  ;;  %v219_v7 = vld [vmem:[%s338_s1 + $0x20] sm:$0xff]   ;;  %v220_v8 = vld [vmem:[%s338_s1 + $0x28] sm:$0xff]   ;;  %v198_v15 = vcombine.low %v19_v5, %v19_v5  ;;  %vm177_vm1 = vcmask 1043456   ;;  %vm181_vm2 = vcmask 257024  }
   0xd   :  { %v221_v9 = vld [vmem:[%s338_s1 + $0x30] sm:$0xff]   ;;  %v222_v10 = vld [vmem:[%s338_s1 + $0x38] sm:$0xff]   ;;  %v223_v11 = vld [vmem:[%s338_s1 + $0x40] sm:$0xff]  }
   0xe   :  { %140 = vmatpush1.bf16.msra.mxu0 %v218_v4  ;;  %212 = vmatprep.mubr.msk.bf16.mxu0 %vm129_vm0, %v199_v6  ;;  %v224_v12 = vld [vmem:[%s338_s1 + $0x48] sm:$0xff]   ;;  %v225_v13 = vld [vmem:[%s338_s1 + $0x50] sm:$0xff]   ;;  %v226_v14 = vld [vmem:[%s338_s1 + $0x58] sm:$0xff]   ;;  %s254_s1 = smov [#allocation2]  }
   0xf   :  { %141 = vmatprep.subr.bf16.mxu0 %v253_v1  ;;  %v173_v16 = vld [vmem:[%s340_s3] sm:$0xf]  ;;  %s189_s18 = sshll.u32 %s254_s1, 4  ;;  %s190_s18 = int_to_ptr.vmem [resolvable:$true] %s189_s18 }
  0x10   :  { %v175_v17 = vrot.slane %v173_v16, 4  ;;  %v197_v18 = vld [vmem:[%s339_s2] ss:$0 sm:$0xff]  ;;  %s229_s3 = scalar_lea.vmem %s190_s18, 64  ;;  %p234_p1 = scmp.lt.s32.totalorder %s190_s18, %s190_s18 }
  0x11   :  { %p230_p0 = scmp.ne.s32.totalorder %s190_s18, %s229_s3  ;;  %p235_p2 = scmp.lt.s32.totalorder %s229_s3, %s229_s3 }
  0x12   :  { %142 = vmatpush1.bf16.msra.mxu0 %v219_v7  ;;  %v178_v20 = vsel %vm177_vm1, %v173_v16, %v175_v17 }
  0x13   :  { %143 = vmatprep.subr.bf16.mxu0 %v253_v1  ;;  %p236_p3 = por %p235_p2, %p234_p1 }
  0x15   :  { %p237_p4 = pnand %p236_p3, %p230_p0 }
  0x16   :  { %144 = vmatpush1.bf16.msra.mxu0 %v220_v8 }
  0x17   :  { %145 = vmatprep.subr.bf16.mxu0 %v253_v1 }
  0x1a   :  { %146 = vmatpush1.bf16.msra.mxu0 %v221_v9 }
  0x1b   :  { %147 = vmatprep.subr.bf16.mxu0 %v253_v1 }
  0x1e   :  { %148 = vmatpush1.bf16.msra.mxu0 %v222_v10 }
  0x1f   :  { %149 = vmatprep.subr.bf16.mxu0 %v253_v1 }
  0x22   :  { %150 = vmatpush1.bf16.msra.mxu0 %v223_v11 }
  0x23   :  { %151 = vmatprep.subr.bf16.mxu0 %v253_v1 }
  0x26   :  { %152 = vmatpush1.bf16.msra.mxu0 %v224_v12 }
  0x27   :  { %153 = vmatprep.subr.bf16.mxu0 %v253_v1 }
  0x2a   :  { %154 = vmatpush1.bf16.msra.mxu0 %v225_v13 }
  0x2b   :  { %155 = vmatprep.subr.bf16.mxu0 %v253_v1 }
  0x2e   :  { %156 = vmatpush1.bf16.msra.mxu0 %v226_v14 }
  0x31   :  { %166 = vmatmul.mubr.bf16.vlgmr.msra.gmra.mrb[0].mxu0 %v198_v15 }
 0x104   :  { %v167_v19 = vpop.f32.mrb[0].mxu0 }
 0x105   :  { %v168_v21 = vadd.f32 %v197_v18, %v167_v19  ;;  %v169_v22 = vpop.f32.mrb[1].mxu0 }
 0x106   :  { %v170_v23 = vpop.f32.mrb[2].mxu0 }
 0x107   :  { %v179_v24 = vadd.f32 %v178_v20, %v168_v21  ;;  %v171_v25 = vpop.f32.mrb[3].mxu0 }
 0x109   :  { %v180_v26 = vpack.c.bf16 %v179_v24, %v179_v24 }
 0x10b   :  { %182 = vst.msk [vmem:[#allocation2] sm:$0xf] %vm181_vm2, %v180_v26 }
 0x10c   :  { %240 = shalt.err (!%p237_p4)
}
 0x10d   :  { %s241_s20 = scalar_lea.hbm %s341_s4, 64 }
 0x10e   :  { %p242_p5 = scmp.ne.s32.totalorder %s341_s4, %s241_s20  ;;  %p245_p6 = scmp.lt.u32.totalorder %s241_s20, %s341_s4 }
 0x110   :  { %p247_p7 = pnand %p245_p6, %p242_p5 }
 0x112   :  { %250 = shalt.err (!%p247_p7)
}
 0x113   :  { %192 = dma.vmem_to_hbm [thread:$0]  %s190_s18, 64, %s341_s4, [#allocation3]  }
 0x114   :  { %251 = dma.done.wait [#allocation3], 64  }
 0x115   :  { %252 = vsyncadd [#allocation3], 4294967232 }
 0x116   :  { %196 = vsyncpa [#allocation3], 1 }

</bundles_post_ra>
